<compile_context>
chip_gen: v5e
topology: v5e:2x2
jax: 0.10.0
libtpu: 0.0.40
codegen_flags: <defaults>
</compile_context>

<pallas_src>
import functools

import jax
import jax.numpy as jnp
from jax import lax
from jax.experimental import pallas as pl
from jax.experimental.pallas import tpu as pltpu

EPS = 1e-5
LANE = 128


def _cdiv(a, b):
    return (a + b - 1) // b


def _round_up(x, m):
    return _cdiv(x, m) * m


def _vmem_budget_bytes():
    # 75% of the physical per-TensorCore VMEM (v5e/v6e: 128 MiB, v7x: 64 MiB).
    try:
        cap = pltpu.get_tpu_info().vmem_capacity_bytes
    except Exception:
        cap = 64 * 1024 * 1024
    return int(0.75 * cap)


def _ln_stats_f32(x, true_d):
    # One-pass LayerNorm statistics: mean and biased variance over the last
    # axis, dividing by the TRUE feature count (so zero-padded columns are
    # harmless).  One fewer XLU cross-lane reduction than two jnp.mean calls.
    s = jnp.sum(x, axis=-1, keepdims=True)
    ss = jnp.sum(x * x, axis=-1, keepdims=True)
    inv_d = 1.0 / true_d
    mean = s * inv_d
    var = jnp.maximum(ss * inv_d - mean * mean, 0.0)
    return mean, var


# --------------------------- fused LN + Linear kernels ------------------------

def _prenorm_linear_single_kernel(x_ref, g_ref, b_ref, w_ref, bias_ref, o_ref,
                                  *, true_d, compute_dtype):
    # Grid = (row_tiles,).  Dout fits one lane-dense tile: normalize in
    # registers and feed the MXU directly (no scratch round trip).
    x = x_ref[...].astype(jnp.float32)
    mean, var = _ln_stats_f32(x, true_d)
    xn = (x - mean) * lax.rsqrt(var + EPS)                 # rsqrt -> EUP slot
    y = xn * g_ref[...].astype(jnp.float32) + b_ref[...].astype(jnp.float32)
    acc = jnp.dot(y.astype(compute_dtype), w_ref[...],
                  preferred_element_type=jnp.float32)      # MXU, f32 accumulate
    o_ref[...] = (acc + bias_ref[...].astype(jnp.float32)).astype(o_ref.dtype)


def _prenorm_linear_coltiled_kernel(x_ref, g_ref, b_ref, w_ref, bias_ref,
                                    o_ref, normed_ref, *, true_d):
    # Grid = (row_tiles, col_tiles).  NOTE: axis 1 must remain the innermost
    # loop and be marked 'arbitrary' -- the normed scratch computed at j == 0
    # is reused for every output-column tile j of the same row tile.
    @pl.when(pl.program_id(1) == 0)
    def _():
        x = x_ref[...].astype(jnp.float32)
        mean, var = _ln_stats_f32(x, true_d)
        xn = (x - mean) * lax.rsqrt(var + EPS)
        y = xn * g_ref[...].astype(jnp.float32) + b_ref[...].astype(jnp.float32)
        normed_ref[...] = y.astype(normed_ref.dtype)

    acc = jnp.dot(normed_ref[...], w_ref[...],
                  preferred_element_type=jnp.float32)
    o_ref[...] = (acc + bias_ref[...].astype(jnp.float32)).astype(o_ref.dtype)


def _prenorm_linear_ktiled_kernel(x_ref, g_ref, b_ref, w_ref, bias_ref,
                                  o_ref, normed_ref, acc_ref, *, true_d):
    # Grid = (row_tiles, col_tiles, k_tiles).  NOTE: axes 1 and 2 must remain
    # innermost / 'arbitrary' -- the normed scratch computed at (j==0, k==0)
    # is reused for all (j, k) of the same row tile and the f32 accumulator is
    # carried across k.
    j = pl.program_id(1)
    k = pl.program_id(2)
    nk, _, tk = normed_ref.shape

    @pl.when((j == 0) & (k == 0))
    def _():
        x = x_ref[...].astype(jnp.float32)
        mean, var = _ln_stats_f32(x, true_d)
        xn = (x - mean) * lax.rsqrt(var + EPS)
        y = xn * g_ref[...].astype(jnp.float32) + b_ref[...].astype(jnp.float32)
        y = y.astype(normed_ref.dtype)
        for kk in range(nk):                       # static unroll over K tiles
            normed_ref[kk] = y[:, kk * tk:(kk + 1) * tk]

    @pl.when(k == 0)
    def _():
        acc_ref[...] = jnp.zeros_like(acc_ref)

    acc_ref[...] += jnp.dot(normed_ref[k], w_ref[...],
                            preferred_element_type=jnp.float32)

    @pl.when(k == pl.num_programs(2) - 1)
    def _():
        o_ref[...] = (acc_ref[...] + bias_ref[...].astype(jnp.float32)
                      ).astype(o_ref.dtype)


def prenorm_linear_pallas(x2, gamma_p, beta_p, w_p, bias_p, *, true_d,
                          out_features, tn, tk=None,
                          compute_dtype=jnp.bfloat16, max_tile_rows=512):
    """Fused y = LayerNorm(x2) @ w_p + bias_p (sliced to out_features columns).

    x2:      (R, D)           activations (rows = flattened leading dims)
    gamma_p: (1, Dp_in)       LN weight, zero-padded to Dp_in = w_p.shape[0]
    beta_p:  (1, Dp_in)       LN bias,   zero-padded
    w_p:     (Dp_in, Dp_out)  matmul-layout weight, zero-padded; Dp_out % tn == 0
    bias_p:  (1, Dp_out)      linear bias, zero-padded
    """
    R, D = x2.shape
    dp_in, dp_out = w_p.shape
    out_dtype = x2.dtype
    xbytes = jnp.dtype(x2.dtype).itemsize
    cbytes = jnp.dtype(compute_dtype).itemsize
    obytes = jnp.dtype(out_dtype).itemsize

    n_col = dp_out // tn
    nk = dp_in // tk if tk is not None else 1
    use_ktiled = tk is not None and nk > 1
    use_scratch = use_ktiled or n_col > 1

    budget = _vmem_budget_bytes()

    def est_bytes(tr):
        kdim = tk if use_ktiled else dp_in
        e = 2 * tr * dp_in * xbytes                  # x tile (double-buffered)
        e += 2 * 2 * dp_in * 4                       # gamma / beta
        e += 2 * kdim * tn * cbytes                  # weight tile
        e += 2 * tn * 4                              # bias tile
        e += 2 * tr * tn * obytes                    # output tile
        if use_scratch:
            e += tr * dp_in * cbytes                 # normed scratch
        if use_ktiled:
            e += tr * tn * 4                         # f32 accumulator
        return e

    # Row tile: even split (minimal zero-row padding), 8-row rounded; split in
    # two when a single tile would cover all rows (keep both v7x TCs busy);
    # shrink until the VMEM estimate fits the device budget.
    n_row_tiles = max(1, _cdiv(R, max_tile_rows))
    tr = _round_up(_cdiv(R, n_row_tiles), 8)
    if _cdiv(R, tr) < 2 and R > 8:
        tr = _round_up(_cdiv(R, 2), 8)
    while est_bytes(tr) > 0.9 * budget and tr > 8:
        tr = max(8, _round_up(tr // 2, 8))
    rp = _round_up(R, tr)

    if rp != R or dp_in != D:
        # TODO(synk): pre-pad x along D upstream for the K-tiled path to avoid
        # this per-call copy when D is not a multiple of tk.
        xp = jnp.pad(x2, ((0, rp - R), (0, dp_in - D)))
    else:
        xp = x2

    vmem_limit = int(min(max(2 * est_bytes(tr), 32 * 1024 * 1024), budget))
    true_d_f = float(true_d)

    if not use_ktiled and n_col == 1:
        out = pl.pallas_call(
            functools.partial(_prenorm_linear_single_kernel,
                              true_d=true_d_f, compute_dtype=compute_dtype),
            out_shape=jax.ShapeDtypeStruct((rp, dp_out), out_dtype),
            grid=(rp // tr,),
            in_specs=[
                pl.BlockSpec((tr, dp_in), lambda i: (i, 0)),
                pl.BlockSpec((1, dp_in), lambda i: (0, 0)),
                pl.BlockSpec((1, dp_in), lambda i: (0, 0)),
                pl.BlockSpec((dp_in, tn), lambda i: (0, 0)),
                pl.BlockSpec((1, tn), lambda i: (0, 0)),
            ],
            out_specs=pl.BlockSpec((tr, tn), lambda i: (i, 0)),
            compiler_params=pltpu.CompilerParams(
                dimension_semantics=("parallel",),
                vmem_limit_bytes=vmem_limit),
        )(xp, gamma_p, beta_p, w_p, bias_p)
    elif not use_ktiled:
        out = pl.pallas_call(
            functools.partial(_prenorm_linear_coltiled_kernel, true_d=true_d_f),
            out_shape=jax.ShapeDtypeStruct((rp, dp_out), out_dtype),
            grid=(rp // tr, n_col),
            in_specs=[
                pl.BlockSpec((tr, dp_in), lambda i, j: (i, 0)),
                pl.BlockSpec((1, dp_in), lambda i, j: (0, 0)),
                pl.BlockSpec((1, dp_in), lambda i, j: (0, 0)),
                pl.BlockSpec((dp_in, tn), lambda i, j: (0, j)),
                pl.BlockSpec((1, tn), lambda i, j: (0, j)),
            ],
            out_specs=pl.BlockSpec((tr, tn), lambda i, j: (i, j)),
            scratch_shapes=[pltpu.VMEM((tr, dp_in), compute_dtype)],
            compiler_params=pltpu.CompilerParams(
                dimension_semantics=("parallel", "arbitrary"),
                vmem_limit_bytes=vmem_limit),
        )(xp, gamma_p, beta_p, w_p, bias_p)
    else:
        out = pl.pallas_call(
            functools.partial(_prenorm_linear_ktiled_kernel, true_d=true_d_f),
            out_shape=jax.ShapeDtypeStruct((rp, dp_out), out_dtype),
            grid=(rp // tr, n_col, nk),
            in_specs=[
                pl.BlockSpec((tr, dp_in), lambda i, j, k: (i, 0)),
                pl.BlockSpec((1, dp_in), lambda i, j, k: (0, 0)),
                pl.BlockSpec((1, dp_in), lambda i, j, k: (0, 0)),
                pl.BlockSpec((tk, tn), lambda i, j, k: (k, j)),
                pl.BlockSpec((1, tn), lambda i, j, k: (0, j)),
            ],
            out_specs=pl.BlockSpec((tr, tn), lambda i, j, k: (i, j)),
            scratch_shapes=[pltpu.VMEM((nk, tr, tk), compute_dtype),
                            pltpu.VMEM((tr, tn), jnp.float32)],
            compiler_params=pltpu.CompilerParams(
                dimension_semantics=("parallel", "arbitrary", "arbitrary"),
                vmem_limit_bytes=vmem_limit),
        )(xp, gamma_p, beta_p, w_p, bias_p)

    return out[:R, :out_features]


# --------------------------- standalone LayerNorm (generic fn path) ----------

def _layernorm_kernel(x_ref, g_ref, b_ref, o_ref, *, true_d):
    x = x_ref[...].astype(jnp.float32)
    mean, var = _ln_stats_f32(x, true_d)
    y = (x - mean) * lax.rsqrt(var + EPS) * g_ref[...].astype(jnp.float32) \
        + b_ref[...].astype(jnp.float32)
    o_ref[...] = y.astype(o_ref.dtype)


def layernorm_pallas(x2, gamma, beta, *, max_tile_rows=512):
    R, D = x2.shape
    xbytes = jnp.dtype(x2.dtype).itemsize
    budget = _vmem_budget_bytes()

    def est_bytes(tr):
        return 2 * tr * D * xbytes * 2 + 4 * D * 4   # in + out double-buffered

    n_row_tiles = max(1, _cdiv(R, max_tile_rows))
    tr = _round_up(_cdiv(R, n_row_tiles), 8)
    if _cdiv(R, tr) < 2 and R > 8:
        tr = _round_up(_cdiv(R, 2), 8)
    while est_bytes(tr) > 0.9 * budget and tr > 8:
        tr = max(8, _round_up(tr // 2, 8))
    rp = _round_up(R, tr)
    xp = x2 if rp == R else jnp.pad(x2, ((0, rp - R), (0, 0)))
    vmem_limit = int(min(max(2 * est_bytes(tr), 32 * 1024 * 1024), budget))

    out = pl.pallas_call(
        functools.partial(_layernorm_kernel, true_d=float(D)),
        out_shape=jax.ShapeDtypeStruct((rp, D), x2.dtype),
        grid=(rp // tr,),
        in_specs=[pl.BlockSpec((tr, D), lambda i: (i, 0)),
                  pl.BlockSpec((1, D), lambda i: (0, 0)),
                  pl.BlockSpec((1, D), lambda i: (0, 0))],
        out_specs=pl.BlockSpec((tr, D), lambda i: (i, 0)),
        compiler_params=pltpu.CompilerParams(
            dimension_semantics=("parallel",),
            vmem_limit_bytes=vmem_limit),
    )(xp, gamma.reshape(1, D), beta.reshape(1, D))
    return out[:R]


# --------------------------- module wrappers ----------------------------------

class PreNormLinearPallas:
    """PreNorm whose wrapped fn is a Linear(D -> Dout); LN + matmul fused."""

    def __init__(self, dim, weight, bias, *, compute_dtype=jnp.bfloat16,
                 gamma=None, beta=None, single_tile_max=512, col_tile=256,
                 k_tile=None, max_tile_rows=512):
        D = dim
        w = jnp.asarray(weight)
        assert w.shape[1] == D, w.shape
        Dout = w.shape[0]
        self.out_features = Dout
        self.compute_dtype = compute_dtype
        self.max_tile_rows = max_tile_rows
        self.true_d = D

        # nn.LayerNorm(dim) default init: weight = ones, bias = zeros; learned
        # affine parameters can be supplied instead.
        g = jnp.ones((D,), jnp.float32) if gamma is None \
            else jnp.asarray(gamma, jnp.float32)
        bt = jnp.zeros((D,), jnp.float32) if beta is None \
            else jnp.asarray(beta, jnp.float32)

        cbytes = jnp.dtype(compute_dtype).itemsize

        # Output (N) tiling: always lane-dense (multiple of 128).
        dp_out = _round_up(Dout, LANE)
        if dp_out <= single_tile_max:
            tn = dp_out
        else:
            tn = col_tile
            dp_out = _round_up(Dout, tn)
        self.tn = tn

        # Contraction (K) tiling: bound the double-buffered weight tile.
        if k_tile is not None:
            tk = k_tile
        elif 2 * D * tn * cbytes > 16 * 1024 * 1024:
            tk = max(512, _round_up(_cdiv(2 * 1024 * 1024, tn * cbytes), LANE))
        else:
            tk = None
        if tk is not None:
            tk = min(tk, _round_up(D, LANE))
            dp_in = _round_up(D, tk)
        else:
            dp_in = D
        self.tk = tk

        # One-time transpose / cast / padding (hoisted out of forward).
        w_t = w.T.astype(compute_dtype)                         # (D, Dout)
        self.w_p = jnp.pad(w_t, ((0, dp_in - D), (0, dp_out - Dout)))
        self.bias_p = jnp.pad(jnp.asarray(bias, jnp.float32),
                              (0, dp_out - Dout)).reshape(1, dp_out)
        self.gamma_p = jnp.pad(g, (0, dp_in - D)).reshape(1, dp_in)
        self.beta_p = jnp.pad(bt, (0, dp_in - D)).reshape(1, dp_in)

    def __call__(self, x):
        B, N, D = x.shape
        y = prenorm_linear_pallas(
            x.reshape(B * N, D), self.gamma_p, self.beta_p, self.w_p,
            self.bias_p, true_d=self.true_d, out_features=self.out_features,
            tn=self.tn, tk=self.tk, compute_dtype=self.compute_dtype,
            max_tile_rows=self.max_tile_rows)
        return y.reshape(B, N, self.out_features)


class PreNormPallas:
    """Generic PreNorm: y = fn(LayerNorm(x)) for an arbitrary callable fn."""

    def __init__(self, dim, fn, *, gamma=None, beta=None):
        self.dim = dim
        self.fn = fn
        self.gamma = jnp.ones((dim,), jnp.float32) if gamma is None \
            else jnp.asarray(gamma, jnp.float32)
        self.beta = jnp.zeros((dim,), jnp.float32) if beta is None \
            else jnp.asarray(beta, jnp.float32)

    def __call__(self, x, **kwargs):
        B, N, D = x.shape
        normed = layernorm_pallas(x.reshape(B * N, D), self.gamma, self.beta)
        return self.fn(normed, **kwargs).reshape(B, N, -1)


# --------------------------- main ---------------------------------------------

if __name__ == "__main__":
    key = jax.random.PRNGKey(0)

    def ref_prenorm_linear(x, w, b, g, bt):
        mean = jnp.mean(x, axis=-1, keepdims=True)
        var = jnp.mean((x - mean) ** 2, axis=-1, keepdims=True)
        xn = (x - mean) / jnp.sqrt(var + EPS) * g + bt
        return jnp.einsum("bnd,od->bno", xn, w) + b

    # ---- small shapes: batch=2, seq=8, hidden=32 (single-output-tile path) ---
    B, N, D, Dout = 2, 8, 32, 32
    k_x, k_w, k_b, k_g, k_bt = jax.random.split(key, 5)
    x = jax.random.normal(k_x, (B, N, D), jnp.float32)
    w = jax.random.normal(k_w, (Dout, D), jnp.float32) * 0.05
    b = jax.random.normal(k_b, (Dout,), jnp.float32) * 0.05
    ref = ref_prenorm_linear(x, w, b, 1.0, 0.0)

    m_f32 = PreNormLinearPallas(D, w, b, compute_dtype=jnp.float32)
    out = jax.block_until_ready(m_f32(x))
    assert out.shape == (B, N, Dout), out.shape
    assert jnp.allclose(out, ref, atol=1e-4, rtol=1e-4), \
        float(jnp.max(jnp.abs(out - ref)))

    m_bf16 = PreNormLinearPallas(D, w, b)     # default: bf16 MXU inputs
    out_bf16 = jax.block_until_ready(m_bf16(x))
    assert jnp.allclose(out_bf16, ref, atol=5e-2, rtol=5e-2), \
        float(jnp.max(jnp.abs(out_bf16 - ref)))

    # ---- column-tiled and K-tiled paths (forced small tiles), learned affine -
    D2, Dout2 = 192, 192
    k_x2, k_w2, k_b2 = jax.random.split(k_x, 3)
    x2 = jax.random.normal(k_x2, (B, N, D2), jnp.float32)
    w2 = jax.random.normal(k_w2, (Dout2, D2), jnp.float32) * 0.05
    b2 = jax.random.normal(k_b2, (Dout2,), jnp.float32) * 0.05
    g2 = 1.0 + 0.1 * jax.random.normal(k_g, (D2,), jnp.float32)
    bt2 = 0.1 * jax.random.normal(k_bt, (D2,), jnp.float32)
    ref2 = ref_prenorm_linear(x2, w2, b2, g2, bt2)

    m_col = PreNormLinearPallas(D2, w2, b2, gamma=g2, beta=bt2,
                                compute_dtype=jnp.float32,
                                single_tile_max=128, col_tile=128)
    out_col = jax.block_until_ready(m_col(x2))
    assert jnp.allclose(out_col, ref2, atol=1e-4, rtol=1e-4), \
        float(jnp.max(jnp.abs(out_col - ref2)))

    m_kt = PreNormLinearPallas(D2, w2, b2, gamma=g2, beta=bt2,
                               compute_dtype=jnp.float32,
                               single_tile_max=128, col_tile=128, k_tile=128)
    out_kt = jax.block_until_ready(m_kt(x2))
    assert jnp.allclose(out_kt, ref2, atol=1e-4, rtol=1e-4), \
        float(jnp.max(jnp.abs(out_kt - ref2)))

    # ---- generic PreNorm path (arbitrary fn): LN in Pallas, fn in plain JAX --
    generic = PreNormPallas(D, lambda t: t @ w.T + b)
    out_gen = jax.block_until_ready(generic(x))
    assert jnp.allclose(out_gen, ref, atol=1e-4, rtol=1e-4), \
        float(jnp.max(jnp.abs(out_gen - ref)))

    print("KERNEL_OK")
</pallas_src>

<mosaic_0001>
module attributes {stable_mosaic.version = 11 : i64} {
  func.func @_prenorm_linear_single_kernel(%arg0: i32, %arg1: memref<8x32xf32, #tpu.memory_space<vmem>>, %arg2: memref<1x32xf32, #tpu.memory_space<vmem>>, %arg3: memref<1x32xf32, #tpu.memory_space<vmem>>, %arg4: memref<32x128xf32, #tpu.memory_space<vmem>>, %arg5: memref<1x128xf32, #tpu.memory_space<vmem>>, %arg6: memref<8x128xf32, #tpu.memory_space<vmem>>) attributes {dimension_semantics = [#tpu.dimension_semantics<parallel>], iteration_bounds = array<i64: 2>, scalar_prefetch = 0 : i64, scratch_operands = 0 : i64, tpu.core_type = #tpu.core_type<tc>, window_params = [{transform_indices = @transform_0, window_bounds = array<i64: 8, 32>}, {pipeline_mode = #tpu.pipeline_mode<synchronous>, transform_indices = @transform_1, window_bounds = array<i64: 1, 32>}, {pipeline_mode = #tpu.pipeline_mode<synchronous>, transform_indices = @transform_2, window_bounds = array<i64: 1, 32>}, {pipeline_mode = #tpu.pipeline_mode<synchronous>, transform_indices = @transform_3, window_bounds = array<i64: 32, 128>}, {pipeline_mode = #tpu.pipeline_mode<synchronous>, transform_indices = @transform_4, window_bounds = array<i64: 1, 128>}, {transform_indices = @transform_5, window_bounds = array<i64: 8, 128>}]} {
    %c0 = arith.constant 0 : index
    %c0_0 = arith.constant 0 : index
    %0 = vector.load %arg1[%c0, %c0_0] : memref<8x32xf32, #tpu.memory_space<vmem>>, vector<8x32xf32>
    %cst = arith.constant dense<0.000000e+00> : vector<8xf32>
    %1 = vector.multi_reduction <add>, %0, %cst [1] : vector<8x32xf32> to vector<8xf32>
    %2 = vector.shape_cast %1 : vector<8xf32> to vector<8x1xf32>
    %3 = arith.mulf %0, %0 : vector<8x32xf32>
    %cst_1 = arith.constant dense<0.000000e+00> : vector<8xf32>
    %4 = vector.multi_reduction <add>, %3, %cst_1 [1] : vector<8x32xf32> to vector<8xf32>
    %5 = vector.shape_cast %4 : vector<8xf32> to vector<8x1xf32>
    %cst_2 = arith.constant 3.125000e-02 : f32
    %6 = vector.broadcast %cst_2 : f32 to vector<8x1xf32>
    %7 = arith.mulf %2, %6 : vector<8x1xf32>
    %cst_3 = arith.constant 3.125000e-02 : f32
    %8 = vector.broadcast %cst_3 : f32 to vector<8x1xf32>
    %9 = arith.mulf %5, %8 : vector<8x1xf32>
    %10 = arith.mulf %7, %7 : vector<8x1xf32>
    %11 = arith.subf %9, %10 : vector<8x1xf32>
    %cst_4 = arith.constant 0.000000e+00 : f32
    %12 = vector.broadcast %cst_4 : f32 to vector<8x1xf32>
    %13 = arith.maximumf %11, %12 : vector<8x1xf32>
    %14 = vector.broadcast %7 : vector<8x1xf32> to vector<8x32xf32>
    %15 = arith.subf %0, %14 : vector<8x32xf32>
    %cst_5 = arith.constant 9.99999974E-6 : f32
    %16 = vector.broadcast %cst_5 : f32 to vector<8x1xf32>
    %17 = arith.addf %13, %16 : vector<8x1xf32>
    %18 = math.rsqrt %17 : vector<8x1xf32>
    %19 = vector.broadcast %18 : vector<8x1xf32> to vector<8x32xf32>
    %20 = arith.mulf %15, %19 : vector<8x32xf32>
    %c0_6 = arith.constant 0 : index
    %c0_7 = arith.constant 0 : index
    %21 = vector.load %arg2[%c0_6, %c0_7] : memref<1x32xf32, #tpu.memory_space<vmem>>, vector<1x32xf32>
    %22 = vector.broadcast %21 : vector<1x32xf32> to vector<8x32xf32>
    %23 = arith.mulf %20, %22 : vector<8x32xf32>
    %c0_8 = arith.constant 0 : index
    %c0_9 = arith.constant 0 : index
    %24 = vector.load %arg3[%c0_8, %c0_9] : memref<1x32xf32, #tpu.memory_space<vmem>>, vector<1x32xf32>
    %25 = vector.broadcast %24 : vector<1x32xf32> to vector<8x32xf32>
    %26 = arith.addf %23, %25 : vector<8x32xf32>
    %c0_10 = arith.constant 0 : index
    %c0_11 = arith.constant 0 : index
    %27 = vector.load %arg4[%c0_10, %c0_11] : memref<32x128xf32, #tpu.memory_space<vmem>>, vector<32x128xf32>
    %cst_12 = arith.constant dense<0.000000e+00> : vector<8x128xf32>
    %28 = tpu.matmul %26, %27, %cst_12 {dimension_numbers = #tpu.dot_dimension_numbers<[1], [0], [0], [1], [0, 0, 1, 1], [], []>} : vector<8x32xf32>, vector<32x128xf32>, vector<8x128xf32> -> vector<8x128xf32>
    %c0_13 = arith.constant 0 : index
    %c0_14 = arith.constant 0 : index
    %29 = vector.load %arg5[%c0_13, %c0_14] : memref<1x128xf32, #tpu.memory_space<vmem>>, vector<1x128xf32>
    %30 = vector.broadcast %29 : vector<1x128xf32> to vector<8x128xf32>
    %31 = arith.addf %28, %30 : vector<8x128xf32>
    %c0_15 = arith.constant 0 : index
    %c0_16 = arith.constant 0 : index
    %32 = vector.load %arg6[%c0_15, %c0_16] : memref<8x128xf32, #tpu.memory_space<vmem>>, vector<8x128xf32>
    tpu.vector_store %arg6[%c0_15, %c0_16], %31 {strides = array<i32>} : memref<8x128xf32, #tpu.memory_space<vmem>>, vector<8x128xf32>,
    return
  }
  func.func @transform_0(%arg0: i32) -> (i32, i32) {
    %c0_i32 = arith.constant 0 : i32
    %c0_i32_0 = arith.constant 0 : i32
    return %arg0, %c0_i32 : i32, i32
  }
  func.func @transform_1(%arg0: i32) -> (i32, i32) {
    %c0_i32 = arith.constant 0 : i32
    %c0_i32_0 = arith.constant 0 : i32
    %c0_i32_1 = arith.constant 0 : i32
    return %c0_i32, %c0_i32_0 : i32, i32
  }
  func.func @transform_2(%arg0: i32) -> (i32, i32) {
    %c0_i32 = arith.constant 0 : i32
    %c0_i32_0 = arith.constant 0 : i32
    %c0_i32_1 = arith.constant 0 : i32
    return %c0_i32, %c0_i32_0 : i32, i32
  }
  func.func @transform_3(%arg0: i32) -> (i32, i32) {
    %c0_i32 = arith.constant 0 : i32
    %c0_i32_0 = arith.constant 0 : i32
    %c0_i32_1 = arith.constant 0 : i32
    return %c0_i32, %c0_i32_0 : i32, i32
  }
  func.func @transform_4(%arg0: i32) -> (i32, i32) {
    %c0_i32 = arith.constant 0 : i32
    %c0_i32_0 = arith.constant 0 : i32
    %c0_i32_1 = arith.constant 0 : i32
    return %c0_i32, %c0_i32_0 : i32, i32
  }
  func.func @transform_5(%arg0: i32) -> (i32, i32) {
    %c0_i32 = arith.constant 0 : i32
    %c0_i32_0 = arith.constant 0 : i32
    return %arg0, %c0_i32 : i32, i32
  }
}

</mosaic_0001>

<bundles_post_ra>
// kernel: tpu_custom_call.1
= control target key start
LH: loop header
LB: loop body
LE: loop exit
PB: predicated region body
PF: predicated region fallthrough
CT: control target
= control target key end

     0   :  { %10 = vsyncpa [#allocation3], 0  ;;  %s888_s0 = inlined_call_operand.hbm [shape: f32[16,32], index: 0, kind: input, shape index: {}]   ;;  %s889_s1 = inlined_call_operand.hbm [shape: f32[1,32], index: 1, kind: input, shape index: {}]   ;;  %s890_s2 = inlined_call_operand.vmem [shape: f32[1,32], index: 2, kind: input, shape index: {}]   ;;  %s891_s3 = inlined_call_operand.hbm [shape: f32[32,128], index: 3, kind: input, shape index: {}]   ;;  %s892_s4 = inlined_call_operand.vmem [shape: f32[1,128], index: 4, kind: input, shape index: {}]   ;;  %s893_s5 = inlined_call_operand.hbm [shape: f32[16,128], index: 5, kind: output, shape index: {}]  }
   0x1   :  { %12 = vsyncpa [#allocation3 + $0x1], 0 }
   0x2   :  { %13 = vsyncpa [#allocation6], 0 }
   0x3   :  { %14 = vsyncpa [#allocation4], 0 }
   0x4   :  { %16 = vsyncpa [#allocation4 + $0x1], 0  ;;  %s734_s18 = smov 0   ;;  %s736_s19 = smov 0  }
   0x5   :  { %s738_s20 = smov 0   ;;  %s740_s21 = smov 0  }
   0x6 LB: > { %s755_s22 = sadd.s32 4294967295, %s698_s21   ;;  %s447_s23 = sadd.s32 4294967294, %s698_s21   ;;  %s698_s21 = sphi %s740_s21, %s903_s21   ;;  %s694_s20 = sphi %s738_s20, %s902_s20   ;;  %s690_s19 = sphi %s736_s19, %s901_s19   ;;  %s686_s18 = sphi %s734_s18, %s900_s18  }
   0x7   : > { %p42_p0 = scmp.ne.s32.totalorder %s690_s19, %s686_s18  ;;  %p43_p1 = scmp.eq.s32.totalorder %s755_s22, 0 }
   0x8   : > { %p150_p2 = scmp.eq.s32.totalorder %s755_s22, 1  ;;  %p156_p3 = scmp.eq.s32.totalorder %s447_s23, 1 }
   0x9   : > { %p764_p4 = por %p43_p1, %p42_p0  ;;  %p448_p5 = scmp.ge.s32.totalorder %s698_s21, 1 }
   0xa   : > { %p769_p6 = por %p156_p3, %p42_p0  ;;  %p163_p7 = scmp.lt.s32.totalorder %s698_s21, 3 }
   0xb   : > { %s175_s28 = sshll.u32 %s889_s1, 4  ;;  %s700_s30 = smov [#allocation5]   ;;  %s176_s28 = int_to_ptr.hbm [resolvable:$true] %s175_s28 }
   0xc   : > { %p777_p8 = pnand %p448_p5, %p163_p7  ;;  %s177_s6 = sshll.u32 %s700_s30, 4  ;;  %s178_s6 = int_to_ptr.vmem [resolvable:$true] %s177_s6 }
   0xd   : > { %s189_s9 = sshll.u32 %s891_s3, 4  ;;  %s701_s10 = smov [#allocation7]   ;;  %s190_s9 = int_to_ptr.hbm [resolvable:$true] %s189_s9 }
   0xe   : > { %p476_p10 = pneg %p777_p8  ;;  %s191_s11 = sshll.u32 %s701_s10, 4  ;;  %s192_s11 = int_to_ptr.vmem [resolvable:$true] %s191_s11 }
   0xf   : > { %s702_s12 = smov 128   ;;  %s703_s13 = smov 8  }
  0x10   : > { %p477_p11 = pnand %p476_p10, %p43_p1  ;;  %s790_s14 = sadd.s32 1, %s698_s21  }
  0x11   : > { %s26_s15 = ssub.s32 %s698_s21, %s790_s14  ;;  %s29_s16 = sadd.s32 1, %s694_s20 }
  0x12   : > { %479 = dma.hbm_to_vmem [thread:$0]  (!%p477_p11), %s176_s28, 16, %s178_s6, [#allocation6]  }
  0x13   : > { %482 = dma.hbm_to_vmem [thread:$0]  (!%p477_p11), %s190_s9, 512, %s192_s11, [#allocation6], %s702_s12, %s702_s12, %s703_s13  }
  0x14   : > { %p27_p12 = scmp.eq.s32.totalorder %s26_s15, 0  ;;  %p36_p13 = scmp.ne.s32.totalorder %s694_s20, %s690_s19 }
  0x15   : > { %p37_p0 = scmp.eq.s32.totalorder %s698_s21, 0  ;;  %p493_p7 = scmp.lt.s32.totalorder %s698_s21, 2 }
  0x16   : > { %s799_s17 = scalar_select %p27_p12, %s694_s20, %s29_s16  }
  0x17   : > { %p38_p3 = por %p37_p0, %p36_p13  ;;  %p803_p5 = por %p150_p2, %p36_p13 }
  0x18   : > { %s208_s26 = sand.u32 1, %s694_s20   ;;  %s453_s28 = sshll.u32 %s698_s21, 3 }
  0x19   : > { %s452_s27 = sshll.u32 %s208_s26, 3  ;;  %s216_s7 = scalar_lea.hbm %s888_s0, %s453_s28 }
  0x1a   : > { %s212_s8 = scalar_lea.vmem [#allocation2], %s452_s27  ;;  %s218_s10 = sshll.u32 %s216_s7, 4  ;;  %s219_s10 = int_to_ptr.hbm [resolvable:$true] %s218_s10 }
  0x1b   : > { %s220_s9 = sshll.u32 %s212_s8, 4  ;;  %p813_p10 = pnand %p493_p7, %p38_p3  ;;  %s221_s9 = int_to_ptr.vmem [resolvable:$true] %s220_s9 }
  0x1c   : > { %s209_s12 = scalar_lea.sflag [#allocation3], %s208_s26  ;;  %s598_s13 = sshra.s32 %s219_s10, 4  ;;  %s599_s13 = int_to_ptr.hbm [resolvable:$true] %s598_s13 }
  0x1d   : > { %s600_s15 = scalar_lea.hbm %s599_s13, 8  ;;  %p602_p11 = pneg %p813_p10 }
  0x1e   : > { %p601_p2 = scmp.ne.s32.totalorder %s599_s13, %s600_s15  ;;  %s605_s28 = scalar_lea.hbm %s888_s0, 16 }
  0x1f   : > { %p606_p0 = scmp.lt.s32.totalorder %s599_s13, %s888_s0  ;;  %p607_p3 = scmp.lt.s32.totalorder %s605_s28, %s600_s15 }
  0x20   : > { %p603_p12 = pnand %p602_p11, %p601_p2 }
  0x21   : > { %p608_p7 = por %p607_p3, %p606_p0 }
  0x22   : > { %p604_p13 = pneg %p603_p12 }
  0x24   : > { %p609_p9 = pnand %p608_p7, %p604_p13 }
  0x26   : > { %612 = shalt.err (!%p609_p9)
}
  0x27   : > { %486 = dma.hbm_to_vmem [thread:$0]  (!%p813_p10), %s219_s10, 128, %s221_s9, %s209_s12  }
  0x28   : > { %229 = sbr.rel (%p777_p8) target bundleno = 337 (0x151), region = 40  ;;  %s830_s26 = sand.u32 (!%p777_p8), 1, %s690_s19  }
  0x29   : > { %s455_s7 = sshll.u32 (!%p777_p8), %s830_s26, 3  ;;  %s232_s8 = scalar_lea.sflag (!%p777_p8), [#allocation3], %s830_s26 }
  0x2a   : > { %s235_s13 = scalar_lea.vmem (!%p777_p8), [#allocation2], %s455_s7 }
  0x2d   : > { %673 = dma.done.wait (%p764_p4), %s232_s8, 128  }
  0x2e   : > { %675 = vsyncadd (%p764_p4), %s232_s8, 4294967168 }
  0x2f   : > { %677 = dma.done.wait (%p43_p1), [#allocation6], 528  }
  0x30   : > { %679 = vsyncadd (%p43_p1), [#allocation6], 4294966768  ;;  %vm274_vm0 = vcmask 261120   ;;  %v273_v0 = vld [vmem:[%s235_s13] sm:$0xff]  ;;  %v310_v8 = vld [vmem:[#allocation7] sm:$0xff]  ;;  %s461_s9 = sshll.u32 %s755_s22, 3 }
  0x31   : > { %v275_v1 = vsel %vm274_vm0, %v273_v0, 0.0  ;;  %v278_v2 = vmul.f32 %v273_v0, %v273_v0  ;;  %v313_v5 = vld [vmem:[#allocation7 + $0x18] sm:$0xff]  ;;  %v312_v6 = vld [vmem:[#allocation7 + $0x10] sm:$0xff]  ;;  %v311_v7 = vld [vmem:[#allocation7 + $0x8] sm:$0xff]  ;;  %s353_s12 = scalar_lea.hbm %s893_s5, %s461_s9  ;;  %s272_s27 = scalar_lea.vmem [#allocation8], %s455_s7 }
  0x32   : > { %276 = vadd.xlane.f32.xlu0 %v275_v1  ;;  %333 = vmatpush.msra.mxu0 %v313_v5  ;;  %v533_v23 = vld [vmem:[#allocation5] ss:$0 sm:$0xff]  ;;  %v534_v26 = vld [vmem:[%s890_s2] ss:$0 sm:$0xff]  ;;  %s355_s28 = sshll.u32 %s272_s27, 4  ;;  %s357_s30 = sshll.u32 %s353_s12, 4  ;;  %s356_s28 = int_to_ptr.vmem [resolvable:$true] %s355_s28  ;;  %s358_s30 = int_to_ptr.hbm [resolvable:$true] %s357_s30 }
  0x33   : > { %v279_v3 = vsel %vm274_vm0, %v278_v2, 0.0  ;;  %v535_v29 = vld [vmem:[%s892_s4] ss:$0 sm:$0xff]  ;;  %s343_s6 = scalar_lea.sflag [#allocation4], %s830_s26  ;;  %s642_s22 = sshra.s32 %s358_s30, 4  ;;  %s643_s22 = int_to_ptr.hbm [resolvable:$true] %s642_s22 }
  0x34   : > { %334 = vmatpush.msra.mxu0 %v312_v6  ;;  %s644_s8 = scalar_lea.hbm %s643_s22, 8  ;;  %s648_s29 = scalar_lea.hbm %s893_s5, 16 }
  0x35   : > { %p645_p1 = scmp.ne.s32.totalorder %s643_s22, %s644_s8  ;;  %p649_p9 = scmp.lt.s32.totalorder %s643_s22, %s893_s5 }
  0x36   : > { %335 = vmatpush.msra.mxu0 %v311_v7  ;;  %p650_p10 = scmp.lt.s32.totalorder %s648_s29, %s644_s8 }
  0x37   : > { %p646_p4 = pnand %p645_p1, %p803_p5 }
  0x38   : > { %336 = vmatpush.msra.mxu0 %v310_v8  ;;  %p651_p2 = por %p650_p10, %p649_p9 }
  0x39   : > { %p647_p8 = pneg %p646_p4 }
  0x3a   : > { %280 = vadd.xlane.f32.xlu0 %v279_v3 }
  0x3b   : > { %p652_p11 = pnand %p651_p2, %p647_p8 }
  0xa5   : > { %v277_v4 = vpop.xlane.xlu0 %276 }
  0xa6   : > { %v282_v9 = vmul.f32 0.03125, %v277_v4 }
  0xa8   : > { %v284_v11 = vmul.f32 %v282_v9, %v282_v9  ;;  %v287_v22 = vsub.f32 %v273_v0, %v282_v9 }
  0xad   : > { %v281_v10 = vpop.xlane.xlu0 %280 }
  0xae   : > { %v283_v12 = vmul.f32 0.03125, %v281_v10 }
  0xb0   : > { %v285_v13 = vsub.f32 %v283_v12, %v284_v11 }
  0xb2   : > { %v286_v14 = vmax.f32 %v285_v13, 0.0 }
  0xb4   : > { %v288_v15 = vadd.f32 1e-05, %v286_v14 }
  0xb6   : > { %536 = vrsqrt.f32 %v288_v15  ;;  %vm295_vm2 = vweird.f32 %v288_v15 }
  0xbc   : > { %v537_v16 = vpop.eup %536 }
  0xbd   : > { %v290_v17 = vmul.f32 %v537_v16, %v288_v15  ;;  %vm296_vm1 = vweird.f32 %v537_v16 }
  0xbe   : > { %vm297_vm3 = vmor %vm295_vm2, %vm296_vm1 }
  0xbf   : > { %v291_v18 = vmul.f32 %v537_v16, %v290_v17 }
  0xc1   : > { %v292_v19 = vmul.f32 0.5, %v291_v18 }
  0xc3   : > { %v293_v20 = vsub.f32 1.5, %v292_v19 }
  0xc5   : > { %v294_v21 = vmul.f32 %v537_v16, %v293_v20 }
  0xc7   : > { %v298_v24 = vsel %vm297_vm3, %v537_v16, %v294_v21 }
  0xc8   : > { %v299_v25 = vmul.f32 %v298_v24, %v287_v22 }
  0xca   : > { %v304_v27 = vmul.f32 %v533_v23, %v299_v25 }
  0xcc   : > { %v309_v28 = vadd.f32 %v534_v26, %v304_v27 }
  0xce   : > { %459 = vmatmul.msk.f32.vlgmr.msra.gmra.mxu0 %vm274_vm0, %v309_v28 }
 0x14b   : > { %v338_v30 = vpop.f32.mrf.mxu0 }
 0x14c   : > { %v339_v31 = vadd.f32 %v535_v29, %v338_v30 }
 0x14e   : > { %341 = vst [vmem:[%s272_s27] sm:$0xff] %v339_v31 }
 0x14f   : > { %655 = shalt.err (!%p652_p11)
}
 0x150   : > { %474 = dma.vmem_to_hbm [thread:$0]  (%p803_p5), %s356_s28, 128, %s358_s30, %s343_s6  }
 0x151 PF: > { %s369_s26 = sand.u32 1, %s686_s18   ;;  %p899_p12 = scmp.ge.s32.totalorder %s698_s21, 2 }
 0x152   : > { %s370_s10 = scalar_lea.sflag [#allocation4], %s369_s26 }
 0x153   : > { %p488_p13 = pnand %p899_p12, %p769_p6 }
 0x155   : > { %p489_p0 = pneg %p488_p13 }
 0x157   : > { %681 = dma.done.wait (%p489_p0), %s370_s10, 128  }
 0x158   : > { %683 = vsyncadd (%p489_p0), %s370_s10, 4294967168  ;;  %p19_p3 = scmp.ge.s32.totalorder %s790_s14, 4   ;;  %s900_s18 = smov %s690_s19 }
 0x159   : > { %s901_s19 = smov %s694_s20  ;;  %s902_s20 = smov %s799_s17 }
 0x15a   : > { %s903_s21 = smov %s790_s14  ;;  %21 = sbr.rel (!%p19_p3) target bundleno = 6 (0x6), region = 93 }
 0x15f   :  { %376 = vsyncpa [#allocation3], 1 }
 0x160   :  { %378 = vsyncpa [#allocation3 + $0x1], 1 }
 0x161   :  { %379 = vsyncpa [#allocation6], 1 }
 0x162   :  { %380 = vsyncpa [#allocation4], 1 }
 0x163   :  { %382 = vsyncpa [#allocation4 + $0x1], 1 }

</bundles_post_ra>
